<compile_context>
chip_gen: v5e
topology: v5e:2x2
jax: 0.10.0
libtpu: 0.0.40
codegen_flags: <defaults>
</compile_context>

<pallas_src>
import functools

import jax
import jax.numpy as jnp
from jax.experimental import pallas as pl
from jax.experimental.pallas import tpu as pltpu

_LANE = 128      # lane width (last-dim granularity)
_SUBLANE = 8     # f32 sublane granularity
_SUBLANE_BF16 = 16  # bf16 packs 2 rows per sublane


def _round_up(n, m):
    return ((n + m - 1) // m) * m


# --------------------------------------------------------------------------- #
# Kernel: 4 fused Linear layers (3x Linear+ReLU, then Linear) on one batch tile
# --------------------------------------------------------------------------- #
def _mlp_kernel(x_ref, w1_ref, b1_ref, w2_ref, b2_ref, w3_ref, b3_ref,
                w4_ref, b4_ref, o_ref):
    cdt = w1_ref.dtype  # compute dtype (bf16)

    # In-kernel cast of the (tb, in_dim) tile to bf16 — VPU work, effectively
    # free; avoids a separate XLA pad/cast pass over x in HBM.
    x = x_ref[...].astype(cdt)

    h = jnp.dot(x, w1_ref[...], preferred_element_type=jnp.float32)
    h = jnp.maximum(h + b1_ref[...], 0.0)
    # TODO(synk): dropout omitted (identity in eval/inference forward path)

    h = jnp.dot(h.astype(cdt), w2_ref[...], preferred_element_type=jnp.float32)
    h = jnp.maximum(h + b2_ref[...], 0.0)

    h = jnp.dot(h.astype(cdt), w3_ref[...], preferred_element_type=jnp.float32)
    h = jnp.maximum(h + b3_ref[...], 0.0)

    out = jnp.dot(h.astype(cdt), w4_ref[...], preferred_element_type=jnp.float32)
    o_ref[...] = (out + b4_ref[...]).astype(o_ref.dtype)


# --------------------------------------------------------------------------- #
# One-time parameter preparation (hoisted out of the hot path)
# --------------------------------------------------------------------------- #
def prepare_grasp_params(params, compute_dtype=jnp.bfloat16):
    """Pad internal (hidden) dims to 128 lanes and cast weights to bf16 once.

    The layer-1 input dim and the final output dim stay UNPADDED (they are the
    full array dims of x / the output, so lane-dense weights aren't needed and
    keeping them narrow minimizes HBM traffic).  Padded columns/rows are zero,
    so the math is exact.
    """
    (w1, b1), (w2, b2), (w3, b3), (w4, b4) = params
    h0p = _round_up(w1.shape[1], _LANE)
    h1p = _round_up(w2.shape[1], _LANE)
    h2p = _round_up(w3.shape[1], _LANE)

    def pad_w(w, kp, np_):
        return jnp.pad(w, ((0, kp - w.shape[0]),
                           (0, np_ - w.shape[1]))).astype(compute_dtype)

    def pad_b(b, np_):
        b = b.reshape(1, -1)
        return jnp.pad(b, ((0, 0), (0, np_ - b.shape[1]))).astype(jnp.float32)

    return (
        (pad_w(w1, w1.shape[0], h0p), pad_b(b1, h0p)),   # K = in_dim (unpadded)
        (pad_w(w2, h0p, h1p),        pad_b(b2, h1p)),
        (pad_w(w3, h1p, h2p),        pad_b(b3, h2p)),
        (pad_w(w4, h2p, w4.shape[1]), pad_b(b4, w4.shape[1])),  # N = out_dim (unpadded)
    )


# --------------------------------------------------------------------------- #
# Wrapper
# --------------------------------------------------------------------------- #
def grasp_network_forward(x, prepared_params, *, batch_tile=2048):
    """Fused MLP forward.

    x: (..., input_dim) array (leading dims folded into one batch axis).
    prepared_params: output of prepare_grasp_params (bf16, lane-padded hiddens).
    """
    (w1, b1), (w2, b2), (w3, b3), (w4, b4) = prepared_params
    in_dim = w1.shape[0]
    out_dim = w4.shape[1]
    out_dtype = x.dtype

    lead = x.shape[:-1]
    x2 = x.reshape(-1, in_dim)
    B = x2.shape[0]

    # ---- batch tiling -------------------------------------------------------
    # bf16 activations pack 2 rows per sublane -> use 16-row granularity.
    row_g = _SUBLANE_BF16 if w1.dtype == jnp.bfloat16 else _SUBLANE
    tb = max(row_g, min(batch_tile, _round_up(B, row_g)))
    if tb >= B and B >= 2 * row_g:
        # Keep >=2 grid steps so the "parallel" axis can shard across the two
        # TensorCores of a v7x chip (megacore); no-op for tiny batches.
        tb = _round_up(pl.cdiv(B, 2), row_g)
    tb = _round_up(tb, row_g)
    grid = (pl.cdiv(B, tb),)
    # NOTE: if B % tb != 0 the last block reads unspecified padding rows; their
    # outputs are never written back, so valid rows are unaffected.

    def const_spec(arr):
        shp = arr.shape
        # Constant block index across the grid -> single-buffered resident copy.
        return pl.BlockSpec(shp, lambda i: (0,) * len(shp),
                            pipeline_mode=pl.Buffered(1))

    # ---- VMEM limit (explicit: v5e's scoped default is only 16 MiB) --------
    weight_bytes = sum(int(w.size) * w.dtype.itemsize + int(b.size) * b.dtype.itemsize
                       for (w, b) in prepared_params)
    max_hidden = max(w1.shape[1], w2.shape[1], w3.shape[1])
    per_step = (2 * tb * in_dim * w1.dtype.itemsize            # x tile, dbl-buffered
                + 2 * tb * out_dim * jnp.dtype(out_dtype).itemsize  # out tile, dbl-buffered
                + weight_bytes                                  # constants, single-buffered
                + 4 * tb * max_hidden * 4)                      # live f32 activation scratch
    vmem_limit = int(min(48 << 20, max(16 << 20, 2 * per_step)))

    # ---- cost estimate (advisory, reflects the actual HBM traffic) ---------
    flops = 2 * B * (in_dim * w1.shape[1]
                     + w2.shape[0] * w2.shape[1]
                     + w3.shape[0] * w3.shape[1]
                     + w4.shape[0] * out_dim)
    bytes_accessed = (int(x2.size) * x2.dtype.itemsize
                      + weight_bytes
                      + B * out_dim * jnp.dtype(out_dtype).itemsize)
    cost = pl.CostEstimate(flops=flops, transcendentals=0,
                           bytes_accessed=bytes_accessed)

    out = pl.pallas_call(
        _mlp_kernel,
        out_shape=jax.ShapeDtypeStruct((B, out_dim), out_dtype),
        grid_spec=pltpu.PrefetchScalarGridSpec(
            num_scalar_prefetch=0,
            grid=grid,
            in_specs=[
                # x tile: unpadded, original dtype (last block dim == full dim).
                pl.BlockSpec((tb, in_dim), lambda i: (i, 0)),
                const_spec(w1), const_spec(b1),   # layer 1
                const_spec(w2), const_spec(b2),   # layer 2
                const_spec(w3), const_spec(b3),   # layer 3
                const_spec(w4), const_spec(b4),   # output layer (narrow N)
            ],
            # Narrow output written directly (last block dim == full dim).
            out_specs=pl.BlockSpec((tb, out_dim), lambda i: (i, 0)),
        ),
        compiler_params=pltpu.CompilerParams(
            dimension_semantics=("parallel",),
            vmem_limit_bytes=vmem_limit),
        cost_estimate=cost,
    )(x2, w1, b1, w2, b2, w3, b3, w4, b4)

    return out.reshape(*lead, out_dim)


# --------------------------------------------------------------------------- #
# Init + pure-JAX reference
# --------------------------------------------------------------------------- #
def init_grasp_network_params(key, input_dim, output_dim,
                              hidden_dims=None, num_layers=3):
    """Kaiming-normal (fan_in, relu gain) weights, zero biases — matches
    nn.init.kaiming_normal_(w, nonlinearity='relu') / constant_(b, 0)."""
    if hidden_dims is None:
        hidden_dims = [256, 256, 256]
    if len(hidden_dims) != num_layers:
        hidden_dims = [hidden_dims[0]] * num_layers
    dims = [input_dim] + list(hidden_dims) + [output_dim]
    params = []
    for fan_in, fan_out in zip(dims[:-1], dims[1:]):
        key, sub = jax.random.split(key)
        std = (2.0 / fan_in) ** 0.5
        # stored as (in, out) = PyTorch weight.T
        w = std * jax.random.normal(sub, (fan_in, fan_out), dtype=jnp.float32)
        b = jnp.zeros((1, fan_out), dtype=jnp.float32)
        params.append((w, b))
    return params


def _reference_forward(x, params, compute_dtype=jnp.bfloat16):
    """Pure-JAX reference mirroring the kernel's bf16-matmul / f32-accumulate
    numerics (bias add + ReLU in f32)."""
    h = x
    n = len(params)
    for idx, (w, b) in enumerate(params):
        y = jnp.dot(h.astype(compute_dtype), w.astype(compute_dtype),
                    preferred_element_type=jnp.float32)
        y = y + b.reshape(1, -1).astype(jnp.float32)
        h = jnp.maximum(y, 0.0) if idx < n - 1 else y
    return h.astype(x.dtype)


if __name__ == "__main__":
    key = jax.random.PRNGKey(0)
    k_x, k_p = jax.random.split(key)

    batch = 16
    input_dim = 32
    hidden_dims = [64, 64, 64]
    output_dim = 8

    x = jax.random.normal(k_x, (batch, input_dim), dtype=jnp.float32)
    raw_params = init_grasp_network_params(k_p, input_dim, output_dim,
                                           hidden_dims=hidden_dims,
                                           num_layers=3)
    # Pad/cast weights ONCE (hoisted out of the forward hot path).
    params = prepare_grasp_params(raw_params)

    out = grasp_network_forward(x, params)
    out = jax.block_until_ready(out)

    ref = _reference_forward(x, raw_params)
    assert out.shape == (batch, output_dim)
    assert jnp.allclose(out, ref, atol=2e-2, rtol=2e-2), "mismatch vs reference"

    print("KERNEL_OK")
</pallas_src>

<mosaic_0001>
module attributes {stable_mosaic.version = 11 : i64} {
  func.func @_mlp_kernel(%arg0: i32, %arg1: memref<16x32xf32, #tpu.memory_space<vmem>>, %arg2: memref<32x128xbf16, #tpu.memory_space<vmem>>, %arg3: memref<1x128xf32, #tpu.memory_space<vmem>>, %arg4: memref<128x128xbf16, #tpu.memory_space<vmem>>, %arg5: memref<1x128xf32, #tpu.memory_space<vmem>>, %arg6: memref<128x128xbf16, #tpu.memory_space<vmem>>, %arg7: memref<1x128xf32, #tpu.memory_space<vmem>>, %arg8: memref<128x8xbf16, #tpu.memory_space<vmem>>, %arg9: memref<1x8xf32, #tpu.memory_space<vmem>>, %arg10: memref<16x8xf32, #tpu.memory_space<vmem>>) attributes {dimension_semantics = [#tpu.dimension_semantics<parallel>], iteration_bounds = array<i64: 1>, scalar_prefetch = 0 : i64, scratch_operands = 0 : i64, tpu.core_type = #tpu.core_type<tc>, window_params = [{transform_indices = @transform_0, window_bounds = array<i64: 16, 32>}, {pipeline_mode = #tpu.pipeline_mode<synchronous>, transform_indices = @transform_1, window_bounds = array<i64: 32, 128>}, {pipeline_mode = #tpu.pipeline_mode<synchronous>, transform_indices = @transform_2, window_bounds = array<i64: 1, 128>}, {pipeline_mode = #tpu.pipeline_mode<synchronous>, transform_indices = @transform_3, window_bounds = array<i64: 128, 128>}, {pipeline_mode = #tpu.pipeline_mode<synchronous>, transform_indices = @transform_4, window_bounds = array<i64: 1, 128>}, {pipeline_mode = #tpu.pipeline_mode<synchronous>, transform_indices = @transform_5, window_bounds = array<i64: 128, 128>}, {pipeline_mode = #tpu.pipeline_mode<synchronous>, transform_indices = @transform_6, window_bounds = array<i64: 1, 128>}, {pipeline_mode = #tpu.pipeline_mode<synchronous>, transform_indices = @transform_7, window_bounds = array<i64: 128, 8>}, {pipeline_mode = #tpu.pipeline_mode<synchronous>, transform_indices = @transform_8, window_bounds = array<i64: 1, 8>}, {transform_indices = @transform_9, window_bounds = array<i64: 16, 8>}]} {
    %c0 = arith.constant 0 : index
    %c0_0 = arith.constant 0 : index
    %0 = vector.load %arg1[%c0, %c0_0] : memref<16x32xf32, #tpu.memory_space<vmem>>, vector<16x32xf32>
    %1 = arith.truncf %0 : vector<16x32xf32> to vector<16x32xbf16>
    %c0_1 = arith.constant 0 : index
    %c0_2 = arith.constant 0 : index
    %2 = vector.load %arg2[%c0_1, %c0_2] : memref<32x128xbf16, #tpu.memory_space<vmem>>, vector<32x128xbf16>
    %cst = arith.constant dense<0.000000e+00> : vector<16x128xf32>
    %3 = tpu.matmul %1, %2, %cst {dimension_numbers = #tpu.dot_dimension_numbers<[1], [0], [0], [1], [0, 0, 1, 1], [], []>} : vector<16x32xbf16>, vector<32x128xbf16>, vector<16x128xf32> -> vector<16x128xf32>
    %c0_3 = arith.constant 0 : index
    %c0_4 = arith.constant 0 : index
    %4 = vector.load %arg3[%c0_3, %c0_4] : memref<1x128xf32, #tpu.memory_space<vmem>>, vector<1x128xf32>
    %5 = vector.broadcast %4 : vector<1x128xf32> to vector<16x128xf32>
    %6 = arith.addf %3, %5 : vector<16x128xf32>
    %cst_5 = arith.constant 0.000000e+00 : f32
    %7 = vector.broadcast %cst_5 : f32 to vector<16x128xf32>
    %8 = arith.maximumf %6, %7 : vector<16x128xf32>
    %9 = arith.truncf %8 : vector<16x128xf32> to vector<16x128xbf16>
    %c0_6 = arith.constant 0 : index
    %c0_7 = arith.constant 0 : index
    %10 = vector.load %arg4[%c0_6, %c0_7] : memref<128x128xbf16, #tpu.memory_space<vmem>>, vector<128x128xbf16>
    %cst_8 = arith.constant dense<0.000000e+00> : vector<16x128xf32>
    %11 = tpu.matmul %9, %10, %cst_8 {dimension_numbers = #tpu.dot_dimension_numbers<[1], [0], [0], [1], [0, 0, 1, 1], [], []>} : vector<16x128xbf16>, vector<128x128xbf16>, vector<16x128xf32> -> vector<16x128xf32>
    %c0_9 = arith.constant 0 : index
    %c0_10 = arith.constant 0 : index
    %12 = vector.load %arg5[%c0_9, %c0_10] : memref<1x128xf32, #tpu.memory_space<vmem>>, vector<1x128xf32>
    %13 = vector.broadcast %12 : vector<1x128xf32> to vector<16x128xf32>
    %14 = arith.addf %11, %13 : vector<16x128xf32>
    %cst_11 = arith.constant 0.000000e+00 : f32
    %15 = vector.broadcast %cst_11 : f32 to vector<16x128xf32>
    %16 = arith.maximumf %14, %15 : vector<16x128xf32>
    %17 = arith.truncf %16 : vector<16x128xf32> to vector<16x128xbf16>
    %c0_12 = arith.constant 0 : index
    %c0_13 = arith.constant 0 : index
    %18 = vector.load %arg6[%c0_12, %c0_13] : memref<128x128xbf16, #tpu.memory_space<vmem>>, vector<128x128xbf16>
    %cst_14 = arith.constant dense<0.000000e+00> : vector<16x128xf32>
    %19 = tpu.matmul %17, %18, %cst_14 {dimension_numbers = #tpu.dot_dimension_numbers<[1], [0], [0], [1], [0, 0, 1, 1], [], []>} : vector<16x128xbf16>, vector<128x128xbf16>, vector<16x128xf32> -> vector<16x128xf32>
    %c0_15 = arith.constant 0 : index
    %c0_16 = arith.constant 0 : index
    %20 = vector.load %arg7[%c0_15, %c0_16] : memref<1x128xf32, #tpu.memory_space<vmem>>, vector<1x128xf32>
    %21 = vector.broadcast %20 : vector<1x128xf32> to vector<16x128xf32>
    %22 = arith.addf %19, %21 : vector<16x128xf32>
    %cst_17 = arith.constant 0.000000e+00 : f32
    %23 = vector.broadcast %cst_17 : f32 to vector<16x128xf32>
    %24 = arith.maximumf %22, %23 : vector<16x128xf32>
    %25 = arith.truncf %24 : vector<16x128xf32> to vector<16x128xbf16>
    %c0_18 = arith.constant 0 : index
    %c0_19 = arith.constant 0 : index
    %26 = vector.load %arg8[%c0_18, %c0_19] : memref<128x8xbf16, #tpu.memory_space<vmem>>, vector<128x8xbf16>
    %cst_20 = arith.constant dense<0.000000e+00> : vector<16x8xf32>
    %27 = tpu.matmul %25, %26, %cst_20 {dimension_numbers = #tpu.dot_dimension_numbers<[1], [0], [0], [1], [0, 0, 1, 1], [], []>} : vector<16x128xbf16>, vector<128x8xbf16>, vector<16x8xf32> -> vector<16x8xf32>
    %c0_21 = arith.constant 0 : index
    %c0_22 = arith.constant 0 : index
    %28 = vector.load %arg9[%c0_21, %c0_22] : memref<1x8xf32, #tpu.memory_space<vmem>>, vector<1x8xf32>
    %29 = vector.broadcast %28 : vector<1x8xf32> to vector<16x8xf32>
    %30 = arith.addf %27, %29 : vector<16x8xf32>
    %c0_23 = arith.constant 0 : index
    %c0_24 = arith.constant 0 : index
    %31 = vector.load %arg10[%c0_23, %c0_24] : memref<16x8xf32, #tpu.memory_space<vmem>>, vector<16x8xf32>
    tpu.vector_store %arg10[%c0_23, %c0_24], %30 {strides = array<i32>} : memref<16x8xf32, #tpu.memory_space<vmem>>, vector<16x8xf32>,
    return
  }
  func.func @transform_0(%arg0: i32) -> (i32, i32) {
    %c0_i32 = arith.constant 0 : i32
    %c0_i32_0 = arith.constant 0 : i32
    return %arg0, %c0_i32 : i32, i32
  }
  func.func @transform_1(%arg0: i32) -> (i32, i32) {
    %c0_i32 = arith.constant 0 : i32
    %c0_i32_0 = arith.constant 0 : i32
    %c0_i32_1 = arith.constant 0 : i32
    return %c0_i32, %c0_i32_0 : i32, i32
  }
  func.func @transform_2(%arg0: i32) -> (i32, i32) {
    %c0_i32 = arith.constant 0 : i32
    %c0_i32_0 = arith.constant 0 : i32
    %c0_i32_1 = arith.constant 0 : i32
    return %c0_i32, %c0_i32_0 : i32, i32
  }
  func.func @transform_3(%arg0: i32) -> (i32, i32) {
    %c0_i32 = arith.constant 0 : i32
    %c0_i32_0 = arith.constant 0 : i32
    %c0_i32_1 = arith.constant 0 : i32
    return %c0_i32, %c0_i32_0 : i32, i32
  }
  func.func @transform_4(%arg0: i32) -> (i32, i32) {
    %c0_i32 = arith.constant 0 : i32
    %c0_i32_0 = arith.constant 0 : i32
    %c0_i32_1 = arith.constant 0 : i32
    return %c0_i32, %c0_i32_0 : i32, i32
  }
  func.func @transform_5(%arg0: i32) -> (i32, i32) {
    %c0_i32 = arith.constant 0 : i32
    %c0_i32_0 = arith.constant 0 : i32
    %c0_i32_1 = arith.constant 0 : i32
    return %c0_i32, %c0_i32_0 : i32, i32
  }
  func.func @transform_6(%arg0: i32) -> (i32, i32) {
    %c0_i32 = arith.constant 0 : i32
    %c0_i32_0 = arith.constant 0 : i32
    %c0_i32_1 = arith.constant 0 : i32
    return %c0_i32, %c0_i32_0 : i32, i32
  }
  func.func @transform_7(%arg0: i32) -> (i32, i32) {
    %c0_i32 = arith.constant 0 : i32
    %c0_i32_0 = arith.constant 0 : i32
    %c0_i32_1 = arith.constant 0 : i32
    return %c0_i32, %c0_i32_0 : i32, i32
  }
  func.func @transform_8(%arg0: i32) -> (i32, i32) {
    %c0_i32 = arith.constant 0 : i32
    %c0_i32_0 = arith.constant 0 : i32
    %c0_i32_1 = arith.constant 0 : i32
    return %c0_i32, %c0_i32_0 : i32, i32
  }
  func.func @transform_9(%arg0: i32) -> (i32, i32) {
    %c0_i32 = arith.constant 0 : i32
    %c0_i32_0 = arith.constant 0 : i32
    return %arg0, %c0_i32 : i32, i32
  }
}

</mosaic_0001>

<bundles_post_ra>
// kernel: tpu_custom_call.1
= control target key start
LH: loop header
LB: loop body
LE: loop exit
PB: predicated region body
PF: predicated region fallthrough
CT: control target
= control target key end

     0   :  { %14 = vsyncpa [#allocation3], 0  ;;  %s735_s0 = inlined_call_operand.hbm [shape: f32[16,32], index: 0, kind: input, shape index: {}]   ;;  %s736_s1 = inlined_call_operand.hbm [shape: bf16[32,128], index: 1, kind: input, shape index: {}]   ;;  %s737_s2 = inlined_call_operand.vmem [shape: f32[1,128], index: 2, kind: input, shape index: {}]   ;;  %s738_s3 = inlined_call_operand.vmem [shape: bf16[128,128], index: 3, kind: input, shape index: {}]   ;;  %s739_s4 = inlined_call_operand.vmem [shape: f32[1,128], index: 4, kind: input, shape index: {}]   ;;  %s740_s5 = inlined_call_operand.hbm [shape: bf16[128,128], index: 5, kind: input, shape index: {}]   ;;  %s741_s6 = inlined_call_operand.vmem [shape: f32[1,128], index: 6, kind: input, shape index: {}]   ;;  %s742_s7 = inlined_call_operand.vmem [shape: bf16[128,8], index: 7, kind: input, shape index: {}]   ;;  %s743_s8 = inlined_call_operand.vmem [shape: f32[1,8], index: 8, kind: input, shape index: {}]   ;;  %s744_s9 = inlined_call_operand.vmem [shape: f32[16,8], index: 9, kind: output, shape index: {}]  }
   0x1   :  { %15 = vsyncpa [#allocation5], 0  ;;  %s33_s11 = sshll.u32 %s736_s1, 4  ;;  %s603_s12 = smov [#allocation4]   ;;  %s34_s11 = int_to_ptr.hbm [resolvable:$true] %s33_s11 }
   0x2   :  { %s35_s13 = sshll.u32 %s603_s12, 4  ;;  %s20_s16 = sshll.u32 %s735_s0, 4  ;;  %s36_s13 = int_to_ptr.vmem [resolvable:$true] %s35_s13  ;;  %s21_s16 = int_to_ptr.hbm [resolvable:$true] %s20_s16 }
   0x3   :  { %s604_s17 = smov 64   ;;  %s605_s18 = smov 4  }
   0x4   :  { %41 = dma.hbm_to_vmem [thread:$0]  %s34_s11, 256, %s36_s13, [#allocation5], %s604_s17, %s604_s17, %s605_s18  }
   0x5   :  { %s606_s19 = smov [#allocation2]   ;;  %s607_s21 = smov 128  }
   0x6   :  { %s22_s20 = sshll.u32 %s606_s19, 4  ;;  %s608_s22 = smov 8   ;;  %s23_s20 = int_to_ptr.vmem [resolvable:$true] %s22_s20 }
   0x7   :  { %28 = dma.hbm_to_vmem [thread:$0]  %s21_s16, 256, %s23_s20, [#allocation3], %s607_s21, %s607_s21, %s608_s22  }
   0x8   :  { %s52_s24 = sshll.u32 %s740_s5, 4  ;;  %s609_s25 = smov [#allocation6]   ;;  %s53_s24 = int_to_ptr.hbm [resolvable:$true] %s52_s24 }
   0x9   :  { %s54_s26 = sshll.u32 %s609_s25, 4  ;;  %s55_s26 = int_to_ptr.vmem [resolvable:$true] %s54_s26 }
   0xa   :  { %60 = dma.hbm_to_vmem [thread:$0]  %s53_s24, 1024, %s55_s26, [#allocation5], %s604_s17, %s604_s17, %s605_s18  }
   0xb   :  { %599 = dma.done.wait [#allocation3], 256  }
   0xc   :  { %600 = vsyncadd [#allocation3], 4294967040 }
   0xd   :  { %601 = dma.done.wait [#allocation5], 1280  }
   0xe   :  { %602 = vsyncadd [#allocation5], 4294966016  ;;  %v491_v0 = vld [vmem:[#allocation4 + $0x8] sm:$0xff]  ;;  %v490_v1 = vld [vmem:[#allocation4] sm:$0xff]  ;;  %vm103_vm0 = vcmask 261120   ;;  %vm376_vm1 = vcmask 64512  }
   0xf   :  { %v499_v2 = vld [vmem:[%s738_s3 + $0x38] sm:$0xff]  ;;  %113 = vmatpush.bf16.msra.mxu0 %v491_v0  ;;  %v80_v3 = vld [vmem:[#allocation2] sm:$0xff]  ;;  %v81_v4 = vld [vmem:[#allocation2 + $0x8] sm:$0xff] }
  0x10   :  { %192 = vmatpush.bf16.msra.mxu1 %v499_v2  ;;  %v498_v5 = vld [vmem:[%s738_s3 + $0x30] sm:$0xff]  ;;  %v82_v6 = vpack.c.bf16 %v81_v4, %v80_v3  ;;  %v497_v7 = vld [vmem:[%s738_s3 + $0x28] sm:$0xff]  ;;  %v496_v8 = vld [vmem:[%s738_s3 + $0x20] sm:$0xff] }
  0x11   :  { %v495_v9 = vld [vmem:[%s738_s3 + $0x18] sm:$0xff]  ;;  %v494_v10 = vld [vmem:[%s738_s3 + $0x10] sm:$0xff]  ;;  %v493_v11 = vld [vmem:[%s738_s3 + $0x8] sm:$0xff] }
  0x12   :  { %v492_v12 = vld [vmem:[%s738_s3] sm:$0xff]  ;;  %v507_v13 = vld [vmem:[#allocation6 + $0x38] sm:$0xff]  ;;  %v506_v14 = vld [vmem:[#allocation6 + $0x30] sm:$0xff] }
  0x13   :  { %114 = vmatpush.bf16.msra.mxu0 %v490_v1  ;;  %277 = vmatpush.bf16.msra.mxu2 %v507_v13  ;;  %v505_v15 = vld [vmem:[#allocation6 + $0x28] sm:$0xff]  ;;  %v504_v16 = vld [vmem:[#allocation6 + $0x20] sm:$0xff]  ;;  %v503_v25 = vld [vmem:[#allocation6 + $0x18] sm:$0xff] }
  0x14   :  { %193 = vmatpush.bf16.msra.mxu1 %v498_v5  ;;  %v523_v18 = vld [vmem:[%s737_s2] ss:$0 sm:$0xff]  ;;  %v502_v26 = vld [vmem:[#allocation6 + $0x10] sm:$0xff]  ;;  %v501_v27 = vld [vmem:[#allocation6 + $0x8] sm:$0xff] }
  0x15   :  { %v500_v28 = vld [vmem:[#allocation6] sm:$0xff]  ;;  %v515_v29 = vld [vmem:[%s742_s7 + $0x38] sm:$0xff]  ;;  %v514_v30 = vld [vmem:[%s742_s7 + $0x30] sm:$0xff] }
  0x16   :  { %393 = vmatmul.msk.bf16.vlgmr.msra.gmra.mxu0 %vm103_vm0, %v82_v6  ;;  %362 = vmatpush.bf16.msra.mxu3 %v515_v29  ;;  %v513_v31 = vld [vmem:[%s742_s7 + $0x28] sm:$0xff]  ;;  %v512_v32 = vld [vmem:[%s742_s7 + $0x20] sm:$0xff]  ;;  %v511_v41 = vld [vmem:[%s742_s7 + $0x18] sm:$0xff] }
  0x17   :  { %278 = vmatpush.bf16.msra.mxu2 %v506_v14  ;;  %v524_v34 = vld [vmem:[%s739_s4] ss:$0 sm:$0xff]  ;;  %v510_v42 = vld [vmem:[%s742_s7 + $0x10] sm:$0xff]  ;;  %v509_v43 = vld [vmem:[%s742_s7 + $0x8] sm:$0xff] }
  0x18   :  { %194 = vmatpush.bf16.msra.mxu1 %v497_v7  ;;  %v508_v44 = vld [vmem:[%s742_s7] sm:$0xff] }
  0x19   :  { %v525_v46 = vld [vmem:[%s741_s6] ss:$0 sm:$0xff] }
  0x1a   :  { %363 = vmatpush.bf16.msra.mxu3 %v514_v30  ;;  %v526_v53 = vld [vmem:[%s743_s8] ss:$0 sm:$0xff] }
  0x1b   :  { %279 = vmatpush.bf16.msra.mxu2 %v505_v15 }
  0x1c   :  { %195 = vmatpush.bf16.msra.mxu1 %v496_v8 }
  0x1e   :  { %364 = vmatpush.bf16.msra.mxu3 %v513_v31 }
  0x1f   :  { %280 = vmatpush.bf16.msra.mxu2 %v504_v16 }
  0x20   :  { %196 = vmatpush.bf16.msra.mxu1 %v495_v9 }
  0x22   :  { %365 = vmatpush.bf16.msra.mxu3 %v512_v32 }
  0x23   :  { %281 = vmatpush.bf16.msra.mxu2 %v503_v25 }
  0x24   :  { %197 = vmatpush.bf16.msra.mxu1 %v494_v10 }
  0x26   :  { %366 = vmatpush.bf16.msra.mxu3 %v511_v41 }
  0x27   :  { %282 = vmatpush.bf16.msra.mxu2 %v502_v26 }
  0x28   :  { %198 = vmatpush.bf16.msra.mxu1 %v493_v11 }
  0x2a   :  { %367 = vmatpush.bf16.msra.mxu3 %v510_v42 }
  0x2b   :  { %283 = vmatpush.bf16.msra.mxu2 %v501_v27 }
  0x2c   :  { %199 = vmatpush.bf16.msra.mxu1 %v492_v12 }
  0x2e   :  { %368 = vmatpush.bf16.msra.mxu3 %v509_v43 }
  0x2f   :  { %284 = vmatpush.bf16.msra.mxu2 %v500_v28 }
  0x32   :  { %369 = vmatpush.bf16.msra.mxu3 %v508_v44 }
  0x93   :  { %v116_v17 = vpop.f32.mrf.mxu0 }
  0x94   :  { %v117_v19 = vadd.f32 %v523_v18, %v116_v17 }
  0x96   :  { %v121_v22 = vmax.f32 %v117_v19, 0.0 }
  0x9b   :  { %v118_v20 = vpop.f32.mrf.mxu0 }
  0x9c   :  { %v119_v21 = vadd.f32 %v523_v18, %v118_v20 }
  0x9e   :  { %v122_v23 = vmax.f32 %v119_v21, 0.0 }
  0xa0   :  { %v123_v24 = vpack.c.bf16 %v122_v23, %v121_v22 }
  0xa2   :  { %200 = vmatmul.bf16.vlgmr.msra.gmra.mxu1 %v123_v24 }
 0x11f   :  { %v201_v33 = vpop.f32.mrf.mxu1 }
 0x120   :  { %v202_v35 = vadd.f32 %v524_v34, %v201_v33 }
 0x122   :  { %v206_v38 = vmax.f32 %v202_v35, 0.0 }
 0x127   :  { %v203_v36 = vpop.f32.mrf.mxu1 }
 0x128   :  { %v204_v37 = vadd.f32 %v524_v34, %v203_v36 }
 0x12a   :  { %v207_v39 = vmax.f32 %v204_v37, 0.0 }
 0x12c   :  { %v208_v40 = vpack.c.bf16 %v207_v39, %v206_v38 }
 0x12e   :  { %285 = vmatmul.bf16.vlgmr.msra.gmra.mxu2 %v208_v40 }
 0x1b1   :  { %v286_v45 = vpop.f32.mrf.mxu2 }
 0x1b2   :  { %v287_v47 = vadd.f32 %v525_v46, %v286_v45 }
 0x1b4   :  { %v291_v50 = vmax.f32 %v287_v47, 0.0 }
 0x1b9   :  { %v288_v48 = vpop.f32.mrf.mxu2 }
 0x1ba   :  { %v289_v49 = vadd.f32 %v525_v46, %v288_v48 }
 0x1bc   :  { %v292_v51 = vmax.f32 %v289_v49, 0.0 }
 0x1be   :  { %v293_v52 = vpack.c.bf16 %v292_v51, %v291_v50 }
 0x1c0   :  { %370 = vmatmul.bf16.vlgmr.msra.gmra.mxu3 %v293_v52 }
 0x243   :  { %v371_v54 = vpop.f32.mrf.mxu3 }
 0x244   :  { %v372_v55 = vadd.f32 %v526_v53, %v371_v54 }
 0x246   :  { %377 = vst.msk [vmem:[%s744_s9] sm:$0xff] %vm376_vm1, %v372_v55 }
 0x24b   :  { %v373_v56 = vpop.f32.mrf.mxu3 }
 0x24c   :  { %v374_v57 = vadd.f32 %v526_v53, %v373_v56 }
 0x24e   :  { %378 = vst.msk [vmem:[%s744_s9 + $0x8] sm:$0xff] %vm376_vm1, %v374_v57 }
 0x24f   :  { %383 = vsyncpa [#allocation3], 1 }
 0x250   :  { %384 = vsyncpa [#allocation5], 1 }

</bundles_post_ra>
